<compile_context>
chip_gen: v7x
topology: tpu7x:2x2x1
jax: 0.10.0
libtpu: 0.0.40
codegen_flags: <defaults>
</compile_context>

<pallas_src>
import math

import jax
import jax.numpy as jnp
from jax.experimental import pallas as pl
from jax.experimental.pallas import tpu as pltpu

HIDDEN = 32   # fixed by the module: layer1 = Linear(feature_num, 32)


def _round_up(x, m):
    return (x + m - 1) // m * m


def grand_kernel(x_ref, w1_ref, b1_ref, w2_ref, b2_ref, o_ref):
    # TODO(synk): training-mode dropout (input_droprate / hidden_droprate) is
    # omitted; this is the eval-mode forward where F.dropout is the identity.
    x = x_ref[...]                                              # (TM, F) f32
    # layer1: x @ W1^T + b1, ReLU (f32 MXU matmul, f32 VPU epilogue).
    h = jnp.dot(x, w1_ref[...], preferred_element_type=jnp.float32)
    h = jnp.maximum(h + b1_ref[...], 0.0)                       # (TM, 32) f32
    # layer2: h @ W2^T + b2 (unpadded output width).
    out = jnp.dot(h, w2_ref[...], preferred_element_type=jnp.float32)
    o_ref[...] = (out + b2_ref[...]).astype(o_ref.dtype)        # (TM, O)


def grand_forward(x, w1, b1, w2, b2, *, tile_rows=None):
    """Eval-mode GRANDModel forward: relu(x @ w1.T + b1) @ w2.T + b2.

    x  : (N, F) float32
    w1 : (32, F), b1: (32,)   -- torch layer1 parameters
    w2 : (O, 32), b2: (O,)    -- torch layer2 parameters
    returns (N, O) float32
    """
    n, f = x.shape
    o = w2.shape[0]

    # Pre-transposed weights (one-time, tiny). Everything stays f32: the kernel
    # is HBM-bound, so f32 matmul costs nothing extra and matches torch closely.
    w1_t = w1.T.astype(jnp.float32)                    # (F, 32)
    w2_t = w2.T.astype(jnp.float32)                    # (32, O)
    b1_r = b1.reshape(1, HIDDEN).astype(jnp.float32)
    b2_r = b2.reshape(1, o).astype(jnp.float32)

    # VMEM capacity of the actual chip (64 MiB/TC on v7x, 128 MiB on v5e/v6e).
    try:
        vmem_cap = int(pltpu.get_tpu_info().vmem_capacity_bytes)
    except Exception:  # conservative fallback
        vmem_cap = 64 * 1024 * 1024

    # Bytes per row that scale with the tile: double-buffered f32 x tile,
    # double-buffered f32 out tile, plus f32 intermediates (h, pre-store acc).
    per_row = 2 * f * 4 + 2 * o * 4 + HIDDEN * 4 + o * 4
    weight_bytes = (f * HIDDEN + HIDDEN * o + HIDDEN + o) * 4

    if tile_rows is None:
        budget = int(vmem_cap * 0.45)   # headroom for weights + compiler scratch
        tile_rows = max(8, (min(32768, budget // max(per_row, 1)) // 8) * 8)

    tm = min(tile_rows, _round_up(n, 8))
    # Keep at least 2 grid steps when possible so both v7x TensorCores get work.
    if n >= 16 and pl.cdiv(n, tm) < 2:
        tm = max(8, _round_up(pl.cdiv(n, 2), 8))
    grid = (pl.cdiv(n, tm),)

    need = tm * per_row + 2 * weight_bytes + 2 * 1024 * 1024
    vmem_limit = int(min(vmem_cap - 2 * 1024 * 1024,
                         max(16 * 1024 * 1024, need)))

    cost = pl.CostEstimate(
        flops=2 * n * (f * HIDDEN + HIDDEN * o),
        transcendentals=0,
        bytes_accessed=n * f * 4 + n * o * 4 + weight_bytes,
    )

    return pl.pallas_call(
        grand_kernel,
        out_shape=jax.ShapeDtypeStruct((n, o), jnp.float32),
        grid=grid,
        in_specs=[
            pl.BlockSpec((tm, f), lambda i: (i, 0)),        # x: streamed row tiles
            pl.BlockSpec((f, HIDDEN), lambda i: (0, 0)),    # weights stay resident
            pl.BlockSpec((1, HIDDEN), lambda i: (0, 0)),
            pl.BlockSpec((HIDDEN, o), lambda i: (0, 0)),
            pl.BlockSpec((1, o), lambda i: (0, 0)),
        ],
        # Block equals the full (unpadded) last dim -> legal and contiguous DMA.
        out_specs=pl.BlockSpec((tm, o), lambda i: (i, 0)),
        compiler_params=pltpu.CompilerParams(
            dimension_semantics=("parallel",),   # row tiles shard across v7x TCs
            vmem_limit_bytes=vmem_limit,
        ),
        cost_estimate=cost,
    )(x.astype(jnp.float32), w1_t, b1_r, w2_t, b2_r)


def init_linear_params(key, in_features, out_features):
    """torch.nn.Linear default init: U(-1/sqrt(fan_in), 1/sqrt(fan_in)) for W and b."""
    k_w, k_b = jax.random.split(key)
    bound = 1.0 / math.sqrt(in_features)
    w = jax.random.uniform(k_w, (out_features, in_features), jnp.float32,
                           minval=-bound, maxval=bound)
    b = jax.random.uniform(k_b, (out_features,), jnp.float32,
                           minval=-bound, maxval=bound)
    return w, b


def reference_forward(x, w1, b1, w2, b2):
    h = jnp.maximum(x @ w1.T + b1, 0.0)
    return h @ w2.T + b2


if __name__ == "__main__":
    # Small shapes consistent with the module: N nodes, feature_num, output_num.
    N, FEATURE_NUM, OUTPUT_NUM = 8, 16, 8

    key = jax.random.PRNGKey(0)
    k_x, k_l1, k_l2, k_x2 = jax.random.split(key, 4)

    x = jax.random.normal(k_x, (N, FEATURE_NUM), jnp.float32)
    w1, b1 = init_linear_params(k_l1, FEATURE_NUM, HIDDEN)    # layer1: Linear(F, 32)
    w2, b2 = init_linear_params(k_l2, HIDDEN, OUTPUT_NUM)     # layer2: Linear(32, O)

    out = jax.block_until_ready(grand_forward(x, w1, b1, w2, b2))
    ref = reference_forward(x, w1, b1, w2, b2)
    assert out.shape == (N, OUTPUT_NUM)
    assert jnp.allclose(out, ref, atol=2e-2, rtol=2e-2), "mismatch vs reference"

    # Remainder-tile check: n not a multiple of tile_rows exercises the masked
    # partial-block output write path (locks in OOB-row behavior).
    N2 = 13
    x2 = jax.random.normal(k_x2, (N2, FEATURE_NUM), jnp.float32)
    out2 = jax.block_until_ready(grand_forward(x2, w1, b1, w2, b2, tile_rows=8))
    ref2 = reference_forward(x2, w1, b1, w2, b2)
    assert out2.shape == (N2, OUTPUT_NUM)
    assert jnp.allclose(out2, ref2, atol=2e-2, rtol=2e-2), "remainder-tile mismatch"

    print("KERNEL_OK")
</pallas_src>

<mosaic_0001>
module attributes {stable_mosaic.version = 11 : i64} {
  func.func @grand_kernel(%arg0: i32, %arg1: memref<8x16xf32, #tpu.memory_space<vmem>>, %arg2: memref<16x32xf32, #tpu.memory_space<vmem>>, %arg3: memref<1x32xf32, #tpu.memory_space<vmem>>, %arg4: memref<32x8xf32, #tpu.memory_space<vmem>>, %arg5: memref<1x8xf32, #tpu.memory_space<vmem>>, %arg6: memref<8x8xf32, #tpu.memory_space<vmem>>) attributes {dimension_semantics = [#tpu.dimension_semantics<parallel>], iteration_bounds = array<i64: 1>, scalar_prefetch = 0 : i64, scratch_operands = 0 : i64, tpu.core_type = #tpu.core_type<tc>, window_params = [{transform_indices = @transform_0, window_bounds = array<i64: 8, 16>}, {pipeline_mode = #tpu.pipeline_mode<synchronous>, transform_indices = @transform_1, window_bounds = array<i64: 16, 32>}, {pipeline_mode = #tpu.pipeline_mode<synchronous>, transform_indices = @transform_2, window_bounds = array<i64: 1, 32>}, {pipeline_mode = #tpu.pipeline_mode<synchronous>, transform_indices = @transform_3, window_bounds = array<i64: 32, 8>}, {pipeline_mode = #tpu.pipeline_mode<synchronous>, transform_indices = @transform_4, window_bounds = array<i64: 1, 8>}, {transform_indices = @transform_5, window_bounds = array<i64: 8, 8>}]} {
    %c0 = arith.constant 0 : index
    %c0_0 = arith.constant 0 : index
    %0 = vector.load %arg1[%c0, %c0_0] : memref<8x16xf32, #tpu.memory_space<vmem>>, vector<8x16xf32>
    %c0_1 = arith.constant 0 : index
    %c0_2 = arith.constant 0 : index
    %1 = vector.load %arg2[%c0_1, %c0_2] : memref<16x32xf32, #tpu.memory_space<vmem>>, vector<16x32xf32>
    %cst = arith.constant dense<0.000000e+00> : vector<8x32xf32>
    %2 = tpu.matmul %0, %1, %cst {dimension_numbers = #tpu.dot_dimension_numbers<[1], [0], [0], [1], [0, 0, 1, 1], [], []>} : vector<8x16xf32>, vector<16x32xf32>, vector<8x32xf32> -> vector<8x32xf32>
    %c0_3 = arith.constant 0 : index
    %c0_4 = arith.constant 0 : index
    %3 = vector.load %arg3[%c0_3, %c0_4] : memref<1x32xf32, #tpu.memory_space<vmem>>, vector<1x32xf32>
    %4 = vector.broadcast %3 : vector<1x32xf32> to vector<8x32xf32>
    %5 = arith.addf %2, %4 : vector<8x32xf32>
    %cst_5 = arith.constant 0.000000e+00 : f32
    %6 = vector.broadcast %cst_5 : f32 to vector<8x32xf32>
    %7 = arith.maximumf %5, %6 : vector<8x32xf32>
    %c0_6 = arith.constant 0 : index
    %c0_7 = arith.constant 0 : index
    %8 = vector.load %arg4[%c0_6, %c0_7] : memref<32x8xf32, #tpu.memory_space<vmem>>, vector<32x8xf32>
    %cst_8 = arith.constant dense<0.000000e+00> : vector<8x8xf32>
    %9 = tpu.matmul %7, %8, %cst_8 {dimension_numbers = #tpu.dot_dimension_numbers<[1], [0], [0], [1], [0, 0, 1, 1], [], []>} : vector<8x32xf32>, vector<32x8xf32>, vector<8x8xf32> -> vector<8x8xf32>
    %c0_9 = arith.constant 0 : index
    %c0_10 = arith.constant 0 : index
    %10 = vector.load %arg5[%c0_9, %c0_10] : memref<1x8xf32, #tpu.memory_space<vmem>>, vector<1x8xf32>
    %11 = vector.broadcast %10 : vector<1x8xf32> to vector<8x8xf32>
    %12 = arith.addf %9, %11 : vector<8x8xf32>
    %c0_11 = arith.constant 0 : index
    %c0_12 = arith.constant 0 : index
    %13 = vector.load %arg6[%c0_11, %c0_12] : memref<8x8xf32, #tpu.memory_space<vmem>>, vector<8x8xf32>
    tpu.vector_store %arg6[%c0_11, %c0_12], %12 {strides = array<i32>} : memref<8x8xf32, #tpu.memory_space<vmem>>, vector<8x8xf32>,
    return
  }
  func.func @transform_0(%arg0: i32) -> (i32, i32) {
    %c0_i32 = arith.constant 0 : i32
    %c0_i32_0 = arith.constant 0 : i32
    return %arg0, %c0_i32 : i32, i32
  }
  func.func @transform_1(%arg0: i32) -> (i32, i32) {
    %c0_i32 = arith.constant 0 : i32
    %c0_i32_0 = arith.constant 0 : i32
    %c0_i32_1 = arith.constant 0 : i32
    return %c0_i32, %c0_i32_0 : i32, i32
  }
  func.func @transform_2(%arg0: i32) -> (i32, i32) {
    %c0_i32 = arith.constant 0 : i32
    %c0_i32_0 = arith.constant 0 : i32
    %c0_i32_1 = arith.constant 0 : i32
    return %c0_i32, %c0_i32_0 : i32, i32
  }
  func.func @transform_3(%arg0: i32) -> (i32, i32) {
    %c0_i32 = arith.constant 0 : i32
    %c0_i32_0 = arith.constant 0 : i32
    %c0_i32_1 = arith.constant 0 : i32
    return %c0_i32, %c0_i32_0 : i32, i32
  }
  func.func @transform_4(%arg0: i32) -> (i32, i32) {
    %c0_i32 = arith.constant 0 : i32
    %c0_i32_0 = arith.constant 0 : i32
    %c0_i32_1 = arith.constant 0 : i32
    return %c0_i32, %c0_i32_0 : i32, i32
  }
  func.func @transform_5(%arg0: i32) -> (i32, i32) {
    %c0_i32 = arith.constant 0 : i32
    %c0_i32_0 = arith.constant 0 : i32
    return %arg0, %c0_i32 : i32, i32
  }
}

</mosaic_0001>

<bundles_post_ra>
// kernel: tpu_custom_call.1
= control target key start
LH: loop header
LB: loop body
LE: loop exit
PB: predicated region body
PF: predicated region fallthrough
CT: control target
= control target key end

     0   :  { %v274_v2 = vmov 0.0|0.0   ;;  %vm275_vm0 = vmmov 0   ;;  %v276_v4 = vmov 0.0   ;;  %s347_s0 = inlined_call_operand.vmem [shape: f32[8,16], index: 0, kind: input, shape index: {}]   ;;  %s348_s1 = inlined_call_operand.vmem [shape: f32[16,32], index: 1, kind: input, shape index: {}]   ;;  %s349_s2 = inlined_call_operand.vmem [shape: f32[1,32], index: 2, kind: input, shape index: {}]   ;;  %s350_s3 = inlined_call_operand.vmem [shape: f32[32,8], index: 3, kind: input, shape index: {}]   ;;  %s351_s4 = inlined_call_operand.vmem [shape: f32[1,8], index: 4, kind: input, shape index: {}]   ;;  %s352_s5 = inlined_call_operand.hbm [shape: f32[8,8], index: 5, kind: output, shape index: {}]  }
   0x1   :  { %v22_v0 = vld [vmem:[%s348_s1] sm:$0xff]  ;;  %v23_v1 = vld [vmem:[%s348_s1 + $0x8] sm:$0xff]  ;;  %237 = vmatprep.subr.bf16.mxu0 %v274_v2  ;;  %223 = vmatprep.mubr.msk.f32.mxu0 %vm275_vm0, %v276_v4 }
   0x2   :  { %v238_v3 = vpack.c.bf16 %v23_v1, %v22_v0  ;;  %v106_v5 = vld [vmem:[%s350_s3] sm:$0xff]  ;;  %v107_v6 = vld [vmem:[%s350_s3 + $0x8] sm:$0xff]  ;;  %240 = vmatprep.subr.bf16.mxu1 %v274_v2  ;;  %234 = vmatprep.mubr.msk.f32.mxu1 %vm275_vm0, %v276_v4 }
   0x3   :  { %v241_v7 = vpack.c.bf16 %v107_v6, %v106_v5 }
   0x4   :  { %10 = vsyncpa [#allocation3], 0  ;;  %239 = vmatpush3.bf16.msra.mxu0 %v238_v3  ;;  %v21_v8 = vld [vmem:[%s347_s0] sm:$0xff]  ;;  %vm31_vm1 = vcmask 130048   ;;  %v108_v9 = vld [vmem:[%s350_s3 + $0x10] sm:$0xff]  ;;  %vm117_vm2 = vcmask 261120  }
   0x5   :  { %242 = vmatpush3.bf16.msra.mxu1 %v241_v7  ;;  %v109_v10 = vld [vmem:[%s350_s3 + $0x18] sm:$0xff]  ;;  %v207_v12 = vld [vmem:[%s349_s2] ss:$0 sm:$0xff]  ;;  %s277_s9 = smov [#allocation2]   ;;  %vm191_vm3 = vcmask 64512  }
   0x6   :  { %243 = vmatprep.subr.bf16.mxu1 %v274_v2  ;;  %v244_v11 = vpack.c.bf16 %v109_v10, %v108_v9  ;;  %v209_v17 = vld [vmem:[%s351_s4] ss:$0 sm:$0xff]  ;;  %s199_s10 = sshll.u32 %s277_s9, 4  ;;  %s200_s10 = int_to_ptr.vmem [resolvable:$true] %s199_s10 }
   0x7   :  { %224 = vmatmul.mubr.msk.f32.vlgmr.msra.gmra.mrb[0].mxu0 %vm31_vm1, %v21_v8  ;;  %s250_s3 = scalar_lea.vmem %s200_s10, 128  ;;  %p255_p1 = scmp.lt.s32.totalorder %s200_s10, %s200_s10 }
   0x8   :  { %p251_p0 = scmp.ne.s32.totalorder %s200_s10, %s250_s3  ;;  %p256_p2 = scmp.lt.s32.totalorder %s250_s3, %s250_s3 }
   0x9   :  { %245 = vmatpush3.bf16.msra.mxu1 %v244_v11 }
   0xa   :  { %p257_p3 = por %p256_p2, %p255_p1 }
   0xc   :  { %p258_p4 = pnand %p257_p3, %p251_p0 }
  0xda   :  { %v101_v13 = vpop.f32.mrb[0].mxu0 }
  0xdb   :  { %v102_v14 = vadd.f32 %v207_v12, %v101_v13  ;;  %v225_v15 = vpop.f32.mrb[1].mxu0 }
  0xdd   :  { %v105_v16 = vmax.f32 %v102_v14, 0.0 }
  0xdf   :  { %235 = vmatmul.mubr.msk.f32.vlgmr.msra.gmra.mrb[0].mxu1 %vm117_vm2, %v105_v16 }
 0x1b2   :  { %v187_v18 = vpop.f32.mrb[0].mxu1 }
 0x1b3   :  { %v188_v19 = vadd.f32 %v209_v17, %v187_v18  ;;  %v236_v20 = vpop.f32.mrb[1].mxu1 }
 0x1b5   :  { %192 = vst.msk [vmem:[#allocation2] sm:$0xff] %vm191_vm3, %v188_v19 }
 0x1b6   :  { %261 = shalt.err (!%p258_p4)
}
 0x1b7   :  { %s262_s12 = scalar_lea.hbm %s352_s5, 128 }
 0x1b8   :  { %p263_p5 = scmp.ne.s32.totalorder %s352_s5, %s262_s12  ;;  %p266_p6 = scmp.lt.u32.totalorder %s262_s12, %s352_s5 }
 0x1ba   :  { %p268_p7 = pnand %p266_p6, %p263_p5 }
 0x1bc   :  { %271 = shalt.err (!%p268_p7)
}
 0x1bd   :  { %202 = dma.vmem_to_hbm [thread:$0]  %s200_s10, 128, %s352_s5, [#allocation3]  }
 0x1be   :  { %272 = dma.done.wait [#allocation3], 128  }
 0x1bf   :  { %273 = vsyncadd [#allocation3], 4294967168 }
 0x1c0   :  { %206 = vsyncpa [#allocation3], 1 }

</bundles_post_ra>
